<compile_context>
chip_gen: v7x
topology: tpu7x:2x2x1
jax: 0.10.0
libtpu: 0.0.40
codegen_flags: <defaults>
</compile_context>

<pallas_src>
import functools

import jax
import jax.numpy as jnp
from jax import lax
from jax.experimental import pallas as pl
from jax.experimental.pallas import tpu as pltpu

_LANE = 128


def _round_up(x, m):
    return ((x + m - 1) // m) * m


def _kd_kernel(inv_t, r_true, tiles_per_chunk, needs_mask, unroll,
               pred_ref, soft_ref, out_ref):
    """One (batch b, chunk c, row-tile t) step.

    pred_ref / soft_ref blocks: (C, t_r, L) in their native dtype.
    out_ref block:              (t_r, L) f32 per-(batch, chunk) accumulator.
    """
    t = pl.program_id(2)
    n_ch = pred_ref.shape[0]
    t_r, lanes = out_ref.shape

    # ---- Pass 1: per-pixel channel max of the raw logits (running max; only
    # two (t_r, L) f32 slabs live, never a (C, t_r, L) temporary). ----
    def _pass1(c, carry):
        mp, ms = carry
        mp = jnp.maximum(mp, pred_ref[c].astype(jnp.float32))
        ms = jnp.maximum(ms, soft_ref[c].astype(jnp.float32))
        return mp, ms

    max_p, max_s = lax.fori_loop(
        1, n_ch, _pass1,
        (pred_ref[0].astype(jnp.float32), soft_ref[0].astype(jnp.float32)),
        unroll=unroll)

    # ---- Pass 2: running softmax denominators + q-weighted logit gap. ----
    def _pass2(c, carry):
        zp, zs, num = carry
        p_sh = (pred_ref[c].astype(jnp.float32) - max_p) * inv_t
        s_sh = (soft_ref[c].astype(jnp.float32) - max_s) * inv_t
        e_p = jnp.exp(p_sh)                      # EUP: 1 exp / element
        e_s = jnp.exp(s_sh)                      # EUP: 1 exp / element
        return zp + e_p, zs + e_s, num + e_s * (s_sh - p_sh)

    zero = jnp.zeros((t_r, lanes), jnp.float32)
    zp, zs, num = lax.fori_loop(0, n_ch, _pass2, (zero, zero, zero),
                                unroll=unroll)

    # Per-pixel KL = sum_c q_c*(s_sh_c - p_sh_c) + log(Zp/Zs),  q_c = e_s_c/Zs.
    rzs = pl.reciprocal(zs, approx=True)
    kl_pix = num * rzs + jnp.log(zp * rzs)       # single log per pixel

    if needs_mask:
        # Ragged last row tile / clamped duplicate tiles: zero rows that are
        # logically past the true row count.  (Lane padding is handled by the
        # logical block shape; no lane mask needed.)
        row0 = (pl.program_id(1) * tiles_per_chunk + t) * t_r
        rows = lax.broadcasted_iota(jnp.int32, (t_r, lanes), 0) + row0
        kl_pix = jnp.where(rows < r_true, kl_pix, 0.0)

    # First tile writes directly, later tiles accumulate (saves the zero-init
    # store + reload at the head of every (batch, chunk)).
    @pl.when(t == 0)
    def _():
        out_ref[...] = kl_pix

    @pl.when(t > 0)
    def _():
        out_ref[...] = out_ref[...] + kl_pix


def criterion_kd(pred, soft, mask, *, temperature=0.1, upsample=False,
                 max_tile_rows=None):
    """pred, soft: (B, C, H, W) NCHW (f32 or bf16 — pass bf16 end-to-end for
    half the HBM traffic); mask: (B,). Returns scalar f32 loss."""
    if upsample:
        # TODO(synk): bilinear upsample (align_corners=True) path not implemented.
        raise NotImplementedError("upsample=True path not implemented")

    B, C, H, W = pred.shape
    assert soft.shape == (B, C, H, W)

    # ---- Layout: lane-dense 2-D pixel view with NO HBM padding / copies. ----
    if (H * W) % _LANE == 0:
        R, L = (H * W) // _LANE, _LANE           # free contiguous reshape
        pred_v = pred.reshape(B, C, R, L)
        soft_v = soft.reshape(B, C, R, L)
    else:
        R, L = H, W                              # native NCHW, no reshape/pad
        pred_v, soft_v = pred, soft
    l_pad = _round_up(L, _LANE)

    isz_p = jnp.dtype(pred.dtype).itemsize
    isz_s = jnp.dtype(soft.dtype).itemsize
    sub = max({4: 8, 2: 16, 1: 32}.get(isz_p, 8),
              {4: 8, 2: 16, 1: 32}.get(isz_s, 8))

    # ---- Generation-aware VMEM sizing, consistent with vmem_limit_bytes. ----
    try:
        vmem_phys = int(pltpu.get_tpu_info().vmem_capacity_bytes)
    except Exception:                            # conservative (v7x-sized) default
        vmem_phys = 64 * 1024 * 1024
    vmem_limit = min(64 * 1024 * 1024, int(vmem_phys * 0.70))
    vmem_budget = vmem_limit // 2

    # Per row of pixels: 2 inputs x 2 pipeline buffers (native dtype) +
    # double-buffered f32 output block + ~12 (t_r, L) f32 in-body temporaries.
    per_row = l_pad * (2 * C * (isz_p + isz_s) + 2 * 4 + 12 * 4)
    cap = max(sub, vmem_budget // per_row)
    if max_tile_rows is not None:
        cap = max(sub, min(cap, _round_up(max_tile_rows, sub)))

    if cap >= R:
        t_r = R                                  # full dim: always a legal block
    else:
        t_r = max(sub, (cap // sub) * sub)

    n_row_tiles = -(-R // t_r)

    # v7x megacore balance: odd batch counts get a second 'parallel' chunk axis.
    n_chunks = 2 if (B % 2 == 1 and n_row_tiles >= 2) else 1
    tiles_per_chunk = -(-n_row_tiles // n_chunks)
    needs_mask = (R % t_r != 0) or (n_chunks * tiles_per_chunk != n_row_tiles)

    last_tile = n_row_tiles - 1

    def in_map(b, cnk, t):
        # Clamp so the DMA always targets an in-bounds (possibly partial)
        # block; the kernel masks logically-out-of-range rows to zero.
        row_tile = jnp.minimum(cnk * tiles_per_chunk + t, last_tile)
        return (b, 0, row_tile, 0)

    unroll = True if C <= 32 else 8
    kernel = functools.partial(_kd_kernel, 1.0 / float(temperature), R,
                               tiles_per_chunk, needs_mask, unroll)

    partials = pl.pallas_call(
        kernel,
        out_shape=jax.ShapeDtypeStruct((B, n_chunks, t_r, L), jnp.float32),
        grid_spec=pltpu.PrefetchScalarGridSpec(
            num_scalar_prefetch=0,
            grid=(B, n_chunks, tiles_per_chunk),
            in_specs=[
                pl.BlockSpec((None, C, t_r, L), in_map),
                pl.BlockSpec((None, C, t_r, L), in_map),
            ],
            # Same output block across the row-tile axis -> per-(batch, chunk)
            # lane-wide accumulator; reduction axis is last / "arbitrary".
            out_specs=pl.BlockSpec((None, None, t_r, L),
                                   lambda b, cnk, t: (b, cnk, 0, 0)),
        ),
        compiler_params=pltpu.CompilerParams(
            dimension_semantics=("parallel", "parallel", "arbitrary"),
            vmem_limit_bytes=vmem_limit,
        ),
    )(pred_v, soft_v)

    # Tiny finalize in plain JAX on (B, n_chunks, t_r, L)-sized partials.
    mask_f = mask.astype(jnp.float32)
    per_image = jnp.sum(partials, axis=(1, 2, 3)) * (1.0 / float(C * H * W))
    loss = jnp.sum(mask_f * per_image)
    m_num = jnp.sum(mask_f)
    safe_den = jnp.where(m_num > 0.0, m_num, 1.0)     # avoid 0/0 in dead branch
    return jnp.where(m_num > 0.0, loss / safe_den, loss)


def _reference(pred, soft, mask, temperature=0.1):
    """Pure-JAX reference mirroring the PyTorch forward."""
    inv_t = 1.0 / temperature
    log_p = jax.nn.log_softmax(pred.astype(jnp.float32) * inv_t, axis=1)
    log_q = jax.nn.log_softmax(soft.astype(jnp.float32) * inv_t, axis=1)
    q = jnp.exp(log_q)
    kl = q * (log_q - log_p)                        # (B, C, H, W)
    t_loss = jnp.mean(kl, axis=(1, 2, 3))           # per-image mean
    mask = mask.astype(jnp.float32)
    loss = jnp.sum(mask * t_loss)
    m_num = jnp.sum(mask)
    return jnp.where(m_num > 0.0, loss / jnp.where(m_num > 0.0, m_num, 1.0), loss)


if __name__ == "__main__":
    key = jax.random.PRNGKey(0)
    k1, k2, k3, k4, k5, k6 = jax.random.split(key, 6)

    # Loose-ish tolerances: the kernel deliberately uses the approx EUP
    # reciprocal in the teacher normalization.
    RTOL, ATOL = 1e-2, 1e-3

    # Test 1: f32, lane-dense reshape path (H*W % 128 == 0), single row tile.
    B, C, H, W = 2, 4, 16, 16
    pred = jax.random.normal(k1, (B, C, H, W), dtype=jnp.float32)
    soft = jax.random.normal(k2, (B, C, H, W), dtype=jnp.float32)
    mask = jnp.array([1.0, 0.5], dtype=jnp.float32)
    out = jax.block_until_ready(criterion_kd(pred, soft, mask, temperature=0.1))
    ref = _reference(pred, soft, mask, temperature=0.1)
    assert jnp.allclose(out, ref, rtol=RTOL, atol=ATOL), (out, ref)

    # Test 2: native-NCHW path (H*W % 128 != 0), forced multi-tile rows with a
    # ragged last tile (in-kernel masking), plus a zero mask entry.
    B2, C2, H2, W2 = 2, 4, 40, 40
    pred2 = jax.random.normal(k3, (B2, C2, H2, W2), dtype=jnp.float32)
    soft2 = jax.random.normal(k4, (B2, C2, H2, W2), dtype=jnp.float32)
    mask2 = jnp.array([0.0, 1.0], dtype=jnp.float32)
    out2 = jax.block_until_ready(
        criterion_kd(pred2, soft2, mask2, temperature=0.1, max_tile_rows=16))
    ref2 = _reference(pred2, soft2, mask2, temperature=0.1)
    assert jnp.allclose(out2, ref2, rtol=RTOL, atol=ATOL), (out2, ref2)

    # Test 3: bf16 inputs (half HBM traffic); in-kernel compute stays f32.
    pred3 = pred2.astype(jnp.bfloat16)
    soft3 = soft2.astype(jnp.bfloat16)
    out3 = jax.block_until_ready(criterion_kd(pred3, soft3, mask2, temperature=0.1))
    ref3 = _reference(pred3, soft3, mask2, temperature=0.1)
    assert jnp.allclose(out3, ref3, rtol=RTOL, atol=ATOL), (out3, ref3)

    # Test 4: odd batch (B=1) -> two 'parallel' chunks with an uneven tile
    # split, exercising the clamped fully-masked duplicate tile.
    B4, C4, H4, W4 = 1, 3, 24, 40
    pred4 = jax.random.normal(k5, (B4, C4, H4, W4), dtype=jnp.float32)
    soft4 = jax.random.normal(k6, (B4, C4, H4, W4), dtype=jnp.float32)
    mask4 = jnp.array([1.0], dtype=jnp.float32)
    out4 = jax.block_until_ready(
        criterion_kd(pred4, soft4, mask4, temperature=0.1, max_tile_rows=8))
    ref4 = _reference(pred4, soft4, mask4, temperature=0.1)
    assert jnp.allclose(out4, ref4, rtol=RTOL, atol=ATOL), (out4, ref4)

    # Test 5: all-zero mask -> loss is exactly 0 (no divide-by-zero poisoning).
    out5 = jax.block_until_ready(
        criterion_kd(pred, soft, jnp.zeros((B,), jnp.float32), temperature=0.1))
    assert jnp.allclose(out5, 0.0, atol=1e-6), out5

    print("KERNEL_OK")
</pallas_src>

<mosaic_0001>
module attributes {stable_mosaic.version = 11 : i64} {
  func.func @_kd_kernel(%arg0: i32, %arg1: i32, %arg2: i32, %arg3: memref<1x4x2x128xf32, #tpu.memory_space<vmem>>, %arg4: memref<1x4x2x128xf32, #tpu.memory_space<vmem>>, %arg5: memref<1x1x2x128xf32, #tpu.memory_space<vmem>>) attributes {dimension_semantics = [#tpu.dimension_semantics<parallel>, #tpu.dimension_semantics<parallel>, #tpu.dimension_semantics<arbitrary>], iteration_bounds = array<i64: 2, 1, 1>, scalar_prefetch = 0 : i64, scratch_operands = 0 : i64, tpu.core_type = #tpu.core_type<tc>, window_params = [{transform_indices = @transform_0, window_bounds = array<i64: 1, 4, 2, 128>}, {transform_indices = @transform_1, window_bounds = array<i64: 1, 4, 2, 128>}, {transform_indices = @transform_2, window_bounds = array<i64: 1, 1, 2, 128>}]} {
    %c0 = arith.constant 0 : index
    %c0_0 = arith.constant 0 : index
    %c0_1 = arith.constant 0 : index
    %c0_2 = arith.constant 0 : index
    %0 = vector.load %arg3[%c0, %c0_0, %c0_1, %c0_2] : memref<1x4x2x128xf32, #tpu.memory_space<vmem>>, vector<1x1x2x128xf32>
    %1 = vector.shape_cast %0 : vector<1x1x2x128xf32> to vector<2x128xf32>
    %c0_3 = arith.constant 0 : index
    %c0_4 = arith.constant 0 : index
    %c0_5 = arith.constant 0 : index
    %c0_6 = arith.constant 0 : index
    %2 = vector.load %arg4[%c0_3, %c0_4, %c0_5, %c0_6] : memref<1x4x2x128xf32, #tpu.memory_space<vmem>>, vector<1x1x2x128xf32>
    %3 = vector.shape_cast %2 : vector<1x1x2x128xf32> to vector<2x128xf32>
    %c1_i32 = arith.constant 1 : i32
    %c0_7 = arith.constant 0 : index
    %4 = arith.index_cast %c1_i32 : i32 to index
    %c0_8 = arith.constant 0 : index
    %c0_9 = arith.constant 0 : index
    %5 = vector.load %arg3[%c0_7, %4, %c0_8, %c0_9] : memref<1x4x2x128xf32, #tpu.memory_space<vmem>>, vector<1x1x2x128xf32>
    %6 = vector.shape_cast %5 : vector<1x1x2x128xf32> to vector<2x128xf32>
    %7 = arith.maximumf %1, %6 : vector<2x128xf32>
    %c0_10 = arith.constant 0 : index
    %8 = arith.index_cast %c1_i32 : i32 to index
    %c0_11 = arith.constant 0 : index
    %c0_12 = arith.constant 0 : index
    %9 = vector.load %arg4[%c0_10, %8, %c0_11, %c0_12] : memref<1x4x2x128xf32, #tpu.memory_space<vmem>>, vector<1x1x2x128xf32>
    %10 = vector.shape_cast %9 : vector<1x1x2x128xf32> to vector<2x128xf32>
    %11 = arith.maximumf %3, %10 : vector<2x128xf32>
    %c2_i32 = arith.constant 2 : i32
    %c0_13 = arith.constant 0 : index
    %12 = arith.index_cast %c2_i32 : i32 to index
    %c0_14 = arith.constant 0 : index
    %c0_15 = arith.constant 0 : index
    %13 = vector.load %arg3[%c0_13, %12, %c0_14, %c0_15] : memref<1x4x2x128xf32, #tpu.memory_space<vmem>>, vector<1x1x2x128xf32>
    %14 = vector.shape_cast %13 : vector<1x1x2x128xf32> to vector<2x128xf32>
    %15 = arith.maximumf %7, %14 : vector<2x128xf32>
    %c0_16 = arith.constant 0 : index
    %16 = arith.index_cast %c2_i32 : i32 to index
    %c0_17 = arith.constant 0 : index
    %c0_18 = arith.constant 0 : index
    %17 = vector.load %arg4[%c0_16, %16, %c0_17, %c0_18] : memref<1x4x2x128xf32, #tpu.memory_space<vmem>>, vector<1x1x2x128xf32>
    %18 = vector.shape_cast %17 : vector<1x1x2x128xf32> to vector<2x128xf32>
    %19 = arith.maximumf %11, %18 : vector<2x128xf32>
    %c3_i32 = arith.constant 3 : i32
    %c0_19 = arith.constant 0 : index
    %20 = arith.index_cast %c3_i32 : i32 to index
    %c0_20 = arith.constant 0 : index
    %c0_21 = arith.constant 0 : index
    %21 = vector.load %arg3[%c0_19, %20, %c0_20, %c0_21] : memref<1x4x2x128xf32, #tpu.memory_space<vmem>>, vector<1x1x2x128xf32>
    %22 = vector.shape_cast %21 : vector<1x1x2x128xf32> to vector<2x128xf32>
    %23 = arith.maximumf %15, %22 : vector<2x128xf32>
    %c0_22 = arith.constant 0 : index
    %24 = arith.index_cast %c3_i32 : i32 to index
    %c0_23 = arith.constant 0 : index
    %c0_24 = arith.constant 0 : index
    %25 = vector.load %arg4[%c0_22, %24, %c0_23, %c0_24] : memref<1x4x2x128xf32, #tpu.memory_space<vmem>>, vector<1x1x2x128xf32>
    %26 = vector.shape_cast %25 : vector<1x1x2x128xf32> to vector<2x128xf32>
    %27 = arith.maximumf %19, %26 : vector<2x128xf32>
    %c3_i32_25 = arith.constant 3 : i32
    %cst = arith.constant 0.000000e+00 : f32
    %28 = vector.broadcast %cst : f32 to vector<2x128xf32>
    %c0_i32 = arith.constant 0 : i32
    %c0_26 = arith.constant 0 : index
    %29 = arith.index_cast %c0_i32 : i32 to index
    %c0_27 = arith.constant 0 : index
    %c0_28 = arith.constant 0 : index
    %30 = vector.load %arg3[%c0_26, %29, %c0_27, %c0_28] : memref<1x4x2x128xf32, #tpu.memory_space<vmem>>, vector<1x1x2x128xf32>
    %31 = vector.shape_cast %30 : vector<1x1x2x128xf32> to vector<2x128xf32>
    %32 = arith.subf %31, %23 : vector<2x128xf32>
    %cst_29 = arith.constant 1.000000e+01 : f32
    %33 = vector.broadcast %cst_29 : f32 to vector<2x128xf32>
    %34 = arith.mulf %32, %33 : vector<2x128xf32>
    %c0_30 = arith.constant 0 : index
    %35 = arith.index_cast %c0_i32 : i32 to index
    %c0_31 = arith.constant 0 : index
    %c0_32 = arith.constant 0 : index
    %36 = vector.load %arg4[%c0_30, %35, %c0_31, %c0_32] : memref<1x4x2x128xf32, #tpu.memory_space<vmem>>, vector<1x1x2x128xf32>
    %37 = vector.shape_cast %36 : vector<1x1x2x128xf32> to vector<2x128xf32>
    %38 = arith.subf %37, %27 : vector<2x128xf32>
    %cst_33 = arith.constant 1.000000e+01 : f32
    %39 = vector.broadcast %cst_33 : f32 to vector<2x128xf32>
    %40 = arith.mulf %38, %39 : vector<2x128xf32>
    %41 = math.exp %34 : vector<2x128xf32>
    %42 = math.exp %40 : vector<2x128xf32>
    %43 = arith.addf %28, %41 : vector<2x128xf32>
    %44 = arith.addf %28, %42 : vector<2x128xf32>
    %45 = arith.subf %40, %34 : vector<2x128xf32>
    %46 = arith.mulf %42, %45 : vector<2x128xf32>
    %47 = arith.addf %28, %46 : vector<2x128xf32>
    %c1_i32_34 = arith.constant 1 : i32
    %c0_35 = arith.constant 0 : index
    %48 = arith.index_cast %c1_i32_34 : i32 to index
    %c0_36 = arith.constant 0 : index
    %c0_37 = arith.constant 0 : index
    %49 = vector.load %arg3[%c0_35, %48, %c0_36, %c0_37] : memref<1x4x2x128xf32, #tpu.memory_space<vmem>>, vector<1x1x2x128xf32>
    %50 = vector.shape_cast %49 : vector<1x1x2x128xf32> to vector<2x128xf32>
    %51 = arith.subf %50, %23 : vector<2x128xf32>
    %cst_38 = arith.constant 1.000000e+01 : f32
    %52 = vector.broadcast %cst_38 : f32 to vector<2x128xf32>
    %53 = arith.mulf %51, %52 : vector<2x128xf32>
    %c0_39 = arith.constant 0 : index
    %54 = arith.index_cast %c1_i32_34 : i32 to index
    %c0_40 = arith.constant 0 : index
    %c0_41 = arith.constant 0 : index
    %55 = vector.load %arg4[%c0_39, %54, %c0_40, %c0_41] : memref<1x4x2x128xf32, #tpu.memory_space<vmem>>, vector<1x1x2x128xf32>
    %56 = vector.shape_cast %55 : vector<1x1x2x128xf32> to vector<2x128xf32>
    %57 = arith.subf %56, %27 : vector<2x128xf32>
    %cst_42 = arith.constant 1.000000e+01 : f32
    %58 = vector.broadcast %cst_42 : f32 to vector<2x128xf32>
    %59 = arith.mulf %57, %58 : vector<2x128xf32>
    %60 = math.exp %53 : vector<2x128xf32>
    %61 = math.exp %59 : vector<2x128xf32>
    %62 = arith.addf %43, %60 : vector<2x128xf32>
    %63 = arith.addf %44, %61 : vector<2x128xf32>
    %64 = arith.subf %59, %53 : vector<2x128xf32>
    %65 = arith.mulf %61, %64 : vector<2x128xf32>
    %66 = arith.addf %47, %65 : vector<2x128xf32>
    %c2_i32_43 = arith.constant 2 : i32
    %c0_44 = arith.constant 0 : index
    %67 = arith.index_cast %c2_i32_43 : i32 to index
    %c0_45 = arith.constant 0 : index
    %c0_46 = arith.constant 0 : index
    %68 = vector.load %arg3[%c0_44, %67, %c0_45, %c0_46] : memref<1x4x2x128xf32, #tpu.memory_space<vmem>>, vector<1x1x2x128xf32>
    %69 = vector.shape_cast %68 : vector<1x1x2x128xf32> to vector<2x128xf32>
    %70 = arith.subf %69, %23 : vector<2x128xf32>
    %cst_47 = arith.constant 1.000000e+01 : f32
    %71 = vector.broadcast %cst_47 : f32 to vector<2x128xf32>
    %72 = arith.mulf %70, %71 : vector<2x128xf32>
    %c0_48 = arith.constant 0 : index
    %73 = arith.index_cast %c2_i32_43 : i32 to index
    %c0_49 = arith.constant 0 : index
    %c0_50 = arith.constant 0 : index
    %74 = vector.load %arg4[%c0_48, %73, %c0_49, %c0_50] : memref<1x4x2x128xf32, #tpu.memory_space<vmem>>, vector<1x1x2x128xf32>
    %75 = vector.shape_cast %74 : vector<1x1x2x128xf32> to vector<2x128xf32>
    %76 = arith.subf %75, %27 : vector<2x128xf32>
    %cst_51 = arith.constant 1.000000e+01 : f32
    %77 = vector.broadcast %cst_51 : f32 to vector<2x128xf32>
    %78 = arith.mulf %76, %77 : vector<2x128xf32>
    %79 = math.exp %72 : vector<2x128xf32>
    %80 = math.exp %78 : vector<2x128xf32>
    %81 = arith.addf %62, %79 : vector<2x128xf32>
    %82 = arith.addf %63, %80 : vector<2x128xf32>
    %83 = arith.subf %78, %72 : vector<2x128xf32>
    %84 = arith.mulf %80, %83 : vector<2x128xf32>
    %85 = arith.addf %66, %84 : vector<2x128xf32>
    %c3_i32_52 = arith.constant 3 : i32
    %c0_53 = arith.constant 0 : index
    %86 = arith.index_cast %c3_i32_52 : i32 to index
    %c0_54 = arith.constant 0 : index
    %c0_55 = arith.constant 0 : index
    %87 = vector.load %arg3[%c0_53, %86, %c0_54, %c0_55] : memref<1x4x2x128xf32, #tpu.memory_space<vmem>>, vector<1x1x2x128xf32>
    %88 = vector.shape_cast %87 : vector<1x1x2x128xf32> to vector<2x128xf32>
    %89 = arith.subf %88, %23 : vector<2x128xf32>
    %cst_56 = arith.constant 1.000000e+01 : f32
    %90 = vector.broadcast %cst_56 : f32 to vector<2x128xf32>
    %91 = arith.mulf %89, %90 : vector<2x128xf32>
    %c0_57 = arith.constant 0 : index
    %92 = arith.index_cast %c3_i32_52 : i32 to index
    %c0_58 = arith.constant 0 : index
    %c0_59 = arith.constant 0 : index
    %93 = vector.load %arg4[%c0_57, %92, %c0_58, %c0_59] : memref<1x4x2x128xf32, #tpu.memory_space<vmem>>, vector<1x1x2x128xf32>
    %94 = vector.shape_cast %93 : vector<1x1x2x128xf32> to vector<2x128xf32>
    %95 = arith.subf %94, %27 : vector<2x128xf32>
    %cst_60 = arith.constant 1.000000e+01 : f32
    %96 = vector.broadcast %cst_60 : f32 to vector<2x128xf32>
    %97 = arith.mulf %95, %96 : vector<2x128xf32>
    %98 = math.exp %91 : vector<2x128xf32>
    %99 = math.exp %97 : vector<2x128xf32>
    %100 = arith.addf %81, %98 : vector<2x128xf32>
    %101 = arith.addf %82, %99 : vector<2x128xf32>
    %102 = arith.subf %97, %91 : vector<2x128xf32>
    %103 = arith.mulf %99, %102 : vector<2x128xf32>
    %104 = arith.addf %85, %103 : vector<2x128xf32>
    %c4_i32 = arith.constant 4 : i32
    %105 = tpu.reciprocal %101 {approx = true} : vector<2x128xf32> -> vector<2x128xf32>
    %106 = arith.mulf %104, %105 : vector<2x128xf32>
    %107 = arith.mulf %100, %105 : vector<2x128xf32>
    %108 = math.log %107 : vector<2x128xf32>
    %109 = arith.addf %106, %108 : vector<2x128xf32>
    %c0_i32_61 = arith.constant 0 : i32
    %110 = arith.cmpi eq, %arg2, %c0_i32_61 : i32
    %111 = arith.extui %110 : i1 to i32
    %c0_i32_62 = arith.constant 0 : i32
    %112 = arith.cmpi ne, %111, %c0_i32_62 : i32
    scf.if %112 {
      %c0_65 = arith.constant 0 : index
      %c0_66 = arith.constant 0 : index
      %c0_67 = arith.constant 0 : index
      %c0_68 = arith.constant 0 : index
      %116 = vector.load %arg5[%c0_65, %c0_66, %c0_67, %c0_68] : memref<1x1x2x128xf32, #tpu.memory_space<vmem>>, vector<1x1x2x128xf32>
      %117 = vector.shape_cast %116 : vector<1x1x2x128xf32> to vector<2x128xf32>
      %118 = vector.shape_cast %109 : vector<2x128xf32> to vector<1x1x2x128xf32>
      tpu.vector_store %arg5[%c0_65, %c0_66, %c0_67, %c0_68], %118 {strides = array<i32>} : memref<1x1x2x128xf32, #tpu.memory_space<vmem>>, vector<1x1x2x128xf32>,
    } else {
    }
    %c0_i32_63 = arith.constant 0 : i32
    %113 = arith.cmpi sgt, %arg2, %c0_i32_63 : i32
    %114 = arith.extui %113 : i1 to i32
    %c0_i32_64 = arith.constant 0 : i32
    %115 = arith.cmpi ne, %114, %c0_i32_64 : i32
    scf.if %115 {
      %c0_65 = arith.constant 0 : index
      %c0_66 = arith.constant 0 : index
      %c0_67 = arith.constant 0 : index
      %c0_68 = arith.constant 0 : index
      %116 = vector.load %arg5[%c0_65, %c0_66, %c0_67, %c0_68] : memref<1x1x2x128xf32, #tpu.memory_space<vmem>>, vector<1x1x2x128xf32>
      %117 = vector.shape_cast %116 : vector<1x1x2x128xf32> to vector<2x128xf32>
      %118 = arith.addf %117, %109 : vector<2x128xf32>
      %c0_69 = arith.constant 0 : index
      %c0_70 = arith.constant 0 : index
      %c0_71 = arith.constant 0 : index
      %c0_72 = arith.constant 0 : index
      %119 = vector.load %arg5[%c0_69, %c0_70, %c0_71, %c0_72] : memref<1x1x2x128xf32, #tpu.memory_space<vmem>>, vector<1x1x2x128xf32>
      %120 = vector.shape_cast %119 : vector<1x1x2x128xf32> to vector<2x128xf32>
      %121 = vector.shape_cast %118 : vector<2x128xf32> to vector<1x1x2x128xf32>
      tpu.vector_store %arg5[%c0_69, %c0_70, %c0_71, %c0_72], %121 {strides = array<i32>} : memref<1x1x2x128xf32, #tpu.memory_space<vmem>>, vector<1x1x2x128xf32>,
    } else {
    }
    return
  }
  func.func @transform_0(%arg0: i32, %arg1: i32, %arg2: i32) -> (i32, i32, i32, i32) {
    %c1_i32 = arith.constant 1 : i32
    %0 = arith.muli %arg1, %c1_i32 : i32
    %1 = arith.addi %0, %arg2 : i32
    %c0_i32 = arith.constant 0 : i32
    %2 = arith.minsi %1, %c0_i32 : i32
    %c0_i32_0 = arith.constant 0 : i32
    %c0_i32_1 = arith.constant 0 : i32
    %c0_i32_2 = arith.constant 0 : i32
    return %arg0, %c0_i32_0, %2, %c0_i32_1 : i32, i32, i32, i32
  }
  func.func @transform_1(%arg0: i32, %arg1: i32, %arg2: i32) -> (i32, i32, i32, i32) {
    %c1_i32 = arith.constant 1 : i32
    %0 = arith.muli %arg1, %c1_i32 : i32
    %1 = arith.addi %0, %arg2 : i32
    %c0_i32 = arith.constant 0 : i32
    %2 = arith.minsi %1, %c0_i32 : i32
    %c0_i32_0 = arith.constant 0 : i32
    %c0_i32_1 = arith.constant 0 : i32
    %c0_i32_2 = arith.constant 0 : i32
    return %arg0, %c0_i32_0, %2, %c0_i32_1 : i32, i32, i32, i32
  }
  func.func @transform_2(%arg0: i32, %arg1: i32, %arg2: i32) -> (i32, i32, i32, i32) {
    %c0_i32 = arith.constant 0 : i32
    %c0_i32_0 = arith.constant 0 : i32
    %c0_i32_1 = arith.constant 0 : i32
    return %arg0, %arg1, %c0_i32, %c0_i32_0 : i32, i32, i32, i32
  }
}

</mosaic_0001>

<bundles_post_ra>
// kernel: tpu_custom_call.1
= control target key start
LH: loop header
LB: loop body
LE: loop exit
PB: predicated region body
PF: predicated region fallthrough
CT: control target
= control target key end

     0   :  { %7 = vsyncpa [#allocation3], 0  ;;  %s985_s0 = inlined_call_operand.hbm [shape: f32[2,4,2,128], index: 0, kind: input, shape index: {}]   ;;  %s986_s1 = inlined_call_operand.hbm [shape: f32[2,4,2,128], index: 1, kind: input, shape index: {}]   ;;  %s987_s2 = inlined_call_operand.hbm [shape: f32[2,1,2,128], index: 2, kind: output, shape index: {}]  }
   0x1   :  { %9 = vsyncpa [#allocation3 + $0x1], 0 }
   0x2   :  { %10 = vsyncpa [#allocation6], 0 }
   0x3   :  { %12 = vsyncpa [#allocation6 + $0x1], 0 }
   0x4   :  { %13 = vsyncpa [#allocation4], 0 }
   0x5   :  { %15 = vsyncpa [#allocation4 + $0x1], 0  ;;  %s750_s9 = smov 0   ;;  %s752_s10 = smov 0  }
   0x6   :  { %s754_s11 = smov 0   ;;  %s756_s12 = smov 0  }
   0x7   :  { %s758_s13 = smov 0   ;;  %s760_s14 = smov 0  }
   0x8 LB: > { %s467_s15 = sadd.s32 4294967295, %s728_s14   ;;  %s468_s16 = sadd.s32 4294967294, %s728_s14   ;;  %s728_s14 = sphi %s760_s14, %s21_s14   ;;  %s724_s13 = sphi %s758_s13, %s1005_s13   ;;  %s720_s12 = sphi %s756_s12, %s1004_s12   ;;  %s716_s11 = sphi %s754_s11, %s1003_s11   ;;  %s712_s10 = sphi %s752_s10, %s1002_s10   ;;  %s708_s9 = sphi %s750_s9, %s1001_s9  }
   0x9   : > { %s40_s17 = sadd.s32 1, %s724_s13  ;;  %s55_s18 = sadd.s32 1, %s716_s11 }
   0xa   : > { %p42_p0 = scmp.ge.s32.totalorder %s40_s17, 2  ;;  %p62_p1 = scmp.ne.s32.totalorder %s716_s11, %s712_s10 }
   0xb   : > { %p63_p2 = scmp.eq.s32.totalorder %s728_s14, 0  ;;  %p68_p3 = scmp.ne.s32.totalorder %s712_s10, %s708_s9 }
   0xc   : > { %s1007_s17 = smov (%p42_p0, %s40_s17), 0  ;;  %p69_p5 = scmp.eq.s32.totalorder %s467_s15, 0 }
   0xd   : > { %p791_p4 = por %p63_p2, %p62_p1  ;;  %s50_s20 = ssub.s32 %s724_s13, %s1007_s17 }
   0xe   : > { %p128_p6 = scmp.eq.s32.totalorder %s467_s15, 1  ;;  %p53_p7 = scmp.eq.s32.totalorder %s50_s20, 0 }
   0xf   : > { %p797_p8 = por %p69_p5, %p68_p3  ;;  %p134_p10 = scmp.eq.s32.totalorder %s468_s16, 1 }
  0x10   : > { %p801_p9 = por %p128_p6, %p62_p1  ;;  %p510_p13 = scmp.lt.s32.totalorder %s728_s14, 2 }
  0x11   : > { %s991_s21 = scalar_select %p797_p8, 1, 0 }
  0x12   : > { %s992_s22 = scalar_select %p801_p9, 1, 0 }
  0x13   : > { %s806_s23 = scalar_select %p53_p7, %s716_s11, %s55_s18  }
  0x14   : > { %p808_p11 = por %p134_p10, %p68_p3  ;;  %s815_s25 = sand.u32 1, %s716_s11  }
  0x15   : > { %s471_s26 = sshll.u32 %s815_s25, 3  ;;  %s491_s27 = sshll.u32 %s724_s13, 7 }
  0x16   : > { %s993_s24 = scalar_select %p808_p11, 1, 0 }
  0x17   : > { %s824_s30 = scalar_lea.hbm %s985_s0, %s491_s27  ;;  %s158_s3 = scalar_lea.vmem [#allocation2], %s471_s26 }
  0x18   : > { %s169_s4 = sshll.u32 %s158_s3, 4  ;;  %p832_p0 = pnand %p510_p13, %p791_p4  ;;  %s828_s4 = int_to_ptr.vmem [resolvable:$true] %s169_s4 }
  0x19   : > { %s155_s6 = scalar_lea.sflag [#allocation3], %s815_s25  ;;  %s582_s7 = scalar_lea.hbm %s824_s30, 128 }
  0x1a   : > { %p583_p2 = scmp.ne.s32.totalorder %s824_s30, %s582_s7  ;;  %p584_p3 = pneg %p832_p0 }
  0x1b   : > { %s587_s16 = scalar_lea.hbm %s985_s0, 256  ;;  %p588_p4 = scmp.lt.u32.totalorder %s824_s30, %s985_s0 }
  0x1c   : > { %p585_p5 = pnand %p584_p3, %p583_p2  ;;  %p589_p7 = scmp.lt.u32.totalorder %s587_s16, %s582_s7 }
  0x1d   : > { %p591_p13 = scmp.lt.u32.totalorder %s582_s7, %s824_s30 }
  0x1e   : > { %p586_p6 = pneg %p585_p5  ;;  %p590_p10 = por %p589_p7, %p588_p4 }
  0x20   : > { %p592_p12 = por %p591_p13, %p590_p10 }
  0x22   : > { %p593_p1 = pnand %p592_p12, %p586_p6 }
  0x24   : > { %596 = shalt.err (!%p593_p1)
}
  0x25   : > { %s597_s20 = scalar_lea.vmem %s828_s4, 128  ;;  %s730_s28 = smov [#allocation2]  }
  0x26   : > { %p598_p2 = scmp.ne.s32.totalorder %s828_s4, %s597_s20  ;;  %s602_s29 = sshll.u32 %s730_s28, 4  ;;  %s603_s29 = int_to_ptr.vmem [resolvable:$false] %s602_s29 }
  0x27   : > { %s604_s3 = scalar_lea.vmem %s603_s29, 256  ;;  %p605_p9 = scmp.lt.s32.totalorder %s828_s4, %s603_s29 }
  0x28   : > { %p600_p5 = pnand %p598_p2, %p584_p3  ;;  %p606_p4 = scmp.lt.s32.totalorder %s604_s3, %s597_s20 }
  0x2a   : > { %p601_p11 = pneg %p600_p5  ;;  %p607_p7 = por %p606_p4, %p605_p9 }
  0x2c   : > { %p608_p10 = pnand %p607_p7, %p601_p11 }
  0x2e   : > { %611 = shalt.err (!%p608_p10)
}
  0x2f   : > { %s731_s7 = smov 32   ;;  %s732_s8 = smov 2  }
  0x30   : > { %502 = dma.hbm_to_vmem [thread:$0]  (!%p832_p0), %s824_s30, 128, %s828_s4, %s155_s6, %s731_s7, %s731_s7, %s732_s8  }
  0x31   : > { %p202_p9 = scmp.lt.s32.totalorder %s728_s14, 3  ;;  %s874_s18 = scalar_lea.hbm %s986_s1, %s491_s27 }
  0x32   : > { %p995_p11 = scmp.ge.s32.totalorder %s728_s14, 1  ;;  %s183_s20 = scalar_lea.vmem [#allocation5], %s471_s26 }
  0x33   : > { %s194_s28 = sshll.u32 %s183_s20, 4  ;;  %s180_s30 = scalar_lea.sflag [#allocation6], %s815_s25  ;;  %s884_s28 = int_to_ptr.vmem [resolvable:$true] %s194_s28 }
  0x34   : > { %p878_p12 = pnand %p995_p11, %p202_p9  ;;  %s612_s4 = scalar_lea.hbm %s874_s18, 128 }
  0x35   : > { %p613_p1 = scmp.ne.s32.totalorder %s874_s18, %s612_s4  ;;  %s617_s29 = scalar_lea.hbm %s986_s1, 256 }
  0x36   : > { %p618_p2 = scmp.lt.u32.totalorder %s874_s18, %s986_s1  ;;  %p619_p5 = scmp.lt.u32.totalorder %s617_s29, %s612_s4 }
  0x37   : > { %p615_p6 = pnand %p613_p1, %p584_p3  ;;  %p621_p7 = scmp.lt.u32.totalorder %s612_s4, %s874_s18 }
  0x38   : > { %p620_p4 = por %p619_p5, %p618_p2 }
  0x39   : > { %p616_p13 = pneg %p615_p6 }
  0x3a   : > { %p622_p10 = por %p621_p7, %p620_p4 }
  0x3c   : > { %p623_p9 = pnand %p622_p10, %p616_p13 }
  0x3e   : > { %626 = shalt.err (!%p623_p9)
}
  0x3f   : > { %s627_s26 = scalar_lea.vmem %s884_s28, 128  ;;  %s733_s16 = smov [#allocation5]  }
  0x40   : > { %p628_p11 = scmp.ne.s32.totalorder %s884_s28, %s627_s26  ;;  %s632_s20 = sshll.u32 %s733_s16, 4  ;;  %s633_s20 = int_to_ptr.vmem [resolvable:$false] %s632_s20 }
  0x41   : > { %s634_s27 = scalar_lea.vmem %s633_s20, 256  ;;  %p635_p8 = scmp.lt.s32.totalorder %s884_s28, %s633_s20 }
  0x42   : > { %p630_p1 = pnand %p628_p11, %p584_p3  ;;  %p636_p2 = scmp.lt.s32.totalorder %s634_s27, %s627_s26 }
  0x44   : > { %p631_p6 = pneg %p630_p1  ;;  %p637_p5 = por %p636_p2, %p635_p8 }
  0x46   : > { %p638_p4 = pnand %p637_p5, %p631_p6 }
  0x48   : > { %641 = shalt.err (!%p638_p4)
}
  0x49   : > { %505 = dma.hbm_to_vmem [thread:$0]  (!%p832_p0), %s874_s18, 128, %s884_s28, %s180_s30, %s731_s7, %s731_s7, %s732_s8  }
  0x4a   : > { %206 = sbr.rel (%p878_p12) target bundleno = 158 (0x9e), region = 28  ;;  %s918_s4 = sand.u32 (!%p878_p12), 1, %s712_s10  }
  0x4b   : > { %s478_s6 = sshll.u32 (!%p878_p12), %s918_s4, 3  ;;  %s209_s29 = scalar_lea.sflag (!%p878_p12), [#allocation3], %s918_s4 }
  0x4c   : > { %s212_s5 = scalar_lea.vmem (!%p878_p12), [#allocation2], %s478_s6  ;;  %p997_p8 = scmp.ne.s32.totalorder (!%p878_p12), %s991_s21, 0 }
  0x51   : > { %695 = dma.done.wait (%p997_p8), %s209_s29, 128  }
  0x52   : > { %697 = vsyncadd (%p997_p8), %s209_s29, 4294967168  ;;  %s218_s25 = scalar_lea.sflag [#allocation6], %s918_s4  ;;  %s221_s7 = scalar_lea.vmem [#allocation5], %s478_s6 }
  0x53   : > { %699 = dma.done.wait (%p997_p8), %s218_s25, 128  }
  0x54   : > { %701 = vsyncadd (%p997_p8), %s218_s25, 4294967168  ;;  %v253_v0 = vld [vmem:[%s212_s5] sm:$0x3]  ;;  %v254_v1 = vld [vmem:[%s221_s7] sm:$0x3]  ;;  %s480_s21 = sshll.u32 %s918_s4, 1 }
  0x55   : > { %v481_v2 = vld [vmem:[%s212_s5 + $0x2] sm:$0x3]  ;;  %v482_v4 = vld [vmem:[%s221_s7 + $0x2] sm:$0x3]  ;;  %v483_v5 = vld [vmem:[%s212_s5 + $0x4] sm:$0x3] }
  0x56   : > { %v257_v3 = vmax.f32 %v253_v0, %v481_v2  ;;  %v484_v6 = vld [vmem:[%s221_s7 + $0x4] sm:$0x3]  ;;  %v260_v7 = vmax.f32 %v254_v1, %v482_v4  ;;  %v485_v8 = vld [vmem:[%s212_s5 + $0x6] sm:$0x3]  ;;  %v486_v10 = vld [vmem:[%s221_s7 + $0x6] sm:$0x3] }
  0x57   : > { %s246_s8 = scalar_lea.vmem [#allocation7], %s480_s21  ;;  %s488_s19 = sshll.u32 %s720_s12, 5 }
  0x58   : > { %v263_v9 = vmax.f32 %v257_v3, %v483_v5  ;;  %v266_v11 = vmax.f32 %v260_v7, %v484_v6  ;;  %s358_s18 = sshll.u32 %s246_s8, 4  ;;  %s938_s3 = scalar_lea.hbm %s987_s2, %s488_s19  ;;  %s933_s18 = int_to_ptr.vmem [resolvable:$true] %s358_s18 }
  0x59   : > { %s344_s15 = scalar_lea.sflag [#allocation4], %s918_s4  ;;  %s642_s26 = scalar_lea.vmem %s933_s18, 32 }
  0x5a   : > { %v269_v12 = vmax.f32 %v263_v9, %v485_v8  ;;  %v272_v13 = vmax.f32 %v266_v11, %v486_v10  ;;  %p643_p0 = scmp.ne.s32.totalorder %s933_s18, %s642_s26  ;;  %p998_p3 = scmp.ne.s32.totalorder %s992_s22, 0 }
  0x5b   : > { %s734_s12 = smov [#allocation7]  }
  0x5c   : > { %v273_v14 = vsub.f32 %v253_v0, %v269_v12  ;;  %v286_v15 = vsub.f32 %v481_v2, %v269_v12  ;;  %v275_v16 = vsub.f32 %v254_v1, %v272_v13  ;;  %v288_v17 = vsub.f32 %v482_v4, %v272_v13  ;;  %p644_p12 = pnand %p643_p0, %p998_p3  ;;  %s646_s16 = sshll.u32 %s734_s12, 4  ;;  %s647_s16 = int_to_ptr.vmem [resolvable:$false] %s646_s16 }
  0x5d   : > { %v301_v18 = vsub.f32 %v484_v6, %v272_v13  ;;  %v314_v19 = vsub.f32 %v486_v10, %v272_v13  ;;  %v299_v25 = vsub.f32 %v483_v5, %v269_v12  ;;  %v312_v33 = vsub.f32 %v485_v8, %v269_v12  ;;  %s648_s20 = scalar_lea.vmem %s647_s16, 64  ;;  %p649_p7 = scmp.lt.s32.totalorder %s933_s18, %s647_s16 }
  0x5e   : > { %v274_v20 = vmul.f32 10.0, %v273_v14  ;;  %v276_v21 = vmul.f32 10.0, %v275_v16  ;;  %v289_v22 = vmul.f32 10.0, %v288_v17  ;;  %v287_v24 = vmul.f32 10.0, %v286_v15  ;;  %p645_p13 = pneg %p644_p12  ;;  %p650_p10 = scmp.lt.s32.totalorder %s648_s20, %s642_s26 }
  0x5f   : > { %v302_v23 = vmul.f32 10.0, %v301_v18  ;;  %v315_v28 = vmul.f32 10.0, %v314_v19  ;;  %v300_v32 = vmul.f32 10.0, %v299_v25  ;;  %v313_v36 = vmul.f32 10.0, %v312_v33 }
  0x60   : > { %v279_v26 = vmul.f32 1.442695, %v276_v21  ;;  %v292_v27 = vmul.f32 1.442695, %v289_v22  ;;  %v277_v29 = vmul.f32 1.442695, %v274_v20  ;;  %v283_v49 = vsub.f32 %v276_v21, %v274_v20  ;;  %p651_p9 = por %p650_p10, %p649_p7 }
  0x61   : > { %v305_v30 = vmul.f32 1.442695, %v302_v23  ;;  %v290_v31 = vmul.f32 1.442695, %v287_v24  ;;  %v318_v34 = vmul.f32 1.442695, %v315_v28  ;;  %v296_v50 = vsub.f32 %v289_v22, %v287_v24 }
  0x62   : > { %562 = vpow2.f32 %v279_v26  ;;  %v303_v35 = vmul.f32 1.442695, %v300_v32  ;;  %v316_v37 = vmul.f32 1.442695, %v313_v36  ;;  %v309_v55 = vsub.f32 %v302_v23, %v300_v32  ;;  %p652_p11 = pnand %p651_p9, %p645_p13 }
  0x63   : > { %564 = vpow2.f32 %v292_v27  ;;  %v322_v60 = vsub.f32 %v315_v28, %v313_v36 }
  0x64   : > { %566 = vpow2.f32 %v277_v29 }
  0x65   : > { %568 = vpow2.f32 %v305_v30 }
  0x66   : > { %570 = vpow2.f32 %v290_v31 }
  0x67   : > { %572 = vpow2.f32 %v318_v34 }
  0x68   : > { %574 = vpow2.f32 %v303_v35 }
  0x69   : > { %576 = vpow2.f32 %v316_v37 }
  0x6c   : > { %v563_v38 = vpop.eup %562 }
  0x6d   : > { %v565_v39 = vpop.eup %564  ;;  %v284_v53 = vmul.f32 %v563_v38, %v283_v49 }
  0x6e   : > { %v567_v40 = vpop.eup %566  ;;  %v295_v41 = vadd.f32 %v565_v39, %v563_v38  ;;  %v297_v54 = vmul.f32 %v565_v39, %v296_v50 }
  0x6f   : > { %v569_v42 = vpop.eup %568 }
  0x70   : > { %v571_v43 = vpop.eup %570  ;;  %v308_v44 = vadd.f32 %v569_v42, %v295_v41  ;;  %v298_v58 = vadd.f32 %v297_v54, %v284_v53  ;;  %v310_v59 = vmul.f32 %v569_v42, %v309_v55 }
  0x71   : > { %v573_v45 = vpop.eup %572  ;;  %v294_v47 = vadd.f32 %v571_v43, %v567_v40 }
  0x72   : > { %v321_v46 = vadd.f32 %v573_v45, %v308_v44  ;;  %v575_v48 = vpop.eup %574  ;;  %v311_v62 = vadd.f32 %v310_v59, %v298_v58  ;;  %v323_v63 = vmul.f32 %v573_v45, %v322_v60 }
  0x73   : > { %v307_v51 = vadd.f32 %v575_v48, %v294_v47  ;;  %v577_v52 = vpop.eup %576 }
  0x74   : > { %578 = vrcp.f32 %v321_v46  ;;  %v324_v0 = vadd.f32 %v323_v63, %v311_v62 }
  0x75   : > { %v320_v56 = vadd.f32 %v577_v52, %v307_v51 }
  0x7e   : > { %v579_v57 = vpop.eup %578 }
  0x7f   : > { %v327_v61 = vmul.f32 %v579_v57, %v320_v56  ;;  %v326_v1 = vmul.f32 %v579_v57, %v324_v0 }
  0x81   : > { %580 = vlog2.f32 %v327_v61 }
  0x8b   : > { %v581_v2 = vpop.eup %580 }
  0x8c   : > { %v329_v3 = vmul.f32 0.6931472, %v581_v2 }
  0x8e   : > { %v330_v4 = vadd.f32 %v329_v3, %v326_v1 }
  0x90   : > { %335 = vst [vmem:[%s246_s8] sm:$0x3] %v330_v4 }
  0x91   : > { %655 = shalt.err (!%p652_p11)
}
  0x92   : > { %s656_s27 = scalar_lea.hbm %s938_s3, 32  ;;  %s660_s29 = scalar_lea.hbm %s987_s2, 64 }
  0x93   : > { %p657_p1 = scmp.ne.s32.totalorder %s938_s3, %s656_s27  ;;  %p661_p5 = scmp.lt.u32.totalorder %s938_s3, %s987_s2 }
  0x94   : > { %p662_p4 = scmp.lt.u32.totalorder %s660_s29, %s656_s27  ;;  %p664_p0 = scmp.lt.u32.totalorder %s656_s27, %s938_s3 }
  0x95   : > { %p658_p6 = pnand %p657_p1, %p998_p3 }
  0x96   : > { %p663_p8 = por %p662_p4, %p661_p5 }
  0x97   : > { %p659_p2 = pneg %p658_p6 }
  0x98   : > { %p665_p12 = por %p664_p0, %p663_p8 }
  0x9a   : > { %p666_p13 = pnand %p665_p12, %p659_p2 }
  0x9c   : > { %669 = shalt.err (!%p666_p13)
}
  0x9d   : > { %497 = dma.vmem_to_hbm [thread:$0]  (%p998_p3), %s933_s18, 32, %s938_s3, %s344_s15  }
  0x9e PF: > { %s370_s7 = sand.u32 1, %s708_s9   ;;  %p999_p7 = scmp.ne.s32.totalorder %s993_s24, 0 }
  0x9f   : > { %p1000_p10 = scmp.ge.s32.totalorder %s728_s14, 2  ;;  %s371_s21 = scalar_lea.sflag [#allocation4], %s370_s7 }
  0xa1   : > { %p507_p9 = pnand %p1000_p10, %p999_p7 }
  0xa3   : > { %703 = dma.done.wait (!%p507_p9), %s371_s21, 32  }
  0xa4   : > { %705 = vsyncadd (!%p507_p9), %s371_s21, 4294967264  ;;  %s21_s14 = sadd.s32 1, %s728_s14   ;;  %s1001_s9 = smov %s712_s10 }
  0xa5   : > { %p18_p11 = scmp.ge.s32.totalorder %s21_s14, 4   ;;  %s1002_s10 = smov %s716_s11 }
  0xa6   : > { %s1003_s11 = smov %s806_s23  ;;  %s1004_s12 = smov %s724_s13 }
  0xa7   : > { %s1005_s13 = smov %s1007_s17  ;;  %20 = sbr.rel (!%p18_p11) target bundleno = 8 (0x8), region = 100 }
  0xae   :  { %376 = vsyncpa [#allocation3], 1 }
  0xaf   :  { %378 = vsyncpa [#allocation3 + $0x1], 1 }
  0xb0   :  { %379 = vsyncpa [#allocation6], 1 }
  0xb1   :  { %381 = vsyncpa [#allocation6 + $0x1], 1 }
  0xb2   :  { %382 = vsyncpa [#allocation4], 1 }
  0xb3   :  { %384 = vsyncpa [#allocation4 + $0x1], 1 }

</bundles_post_ra>
